<compile_context>
chip_gen: v7x
topology: tpu7x:2x2x1
jax: 0.10.0
libtpu: 0.0.40
codegen_flags: <defaults>
</compile_context>

<pallas_src>
import functools
import os

import jax
import jax.numpy as jnp
from jax.experimental import pallas as pl
from jax.experimental.pallas import tpu as pltpu


def _round_up(x, m):
    return (x + m - 1) // m * m


def _aligned_bytes(r, c, itemsize=4):
    # f32 VMEM footprint of an (r, c) block after (8, 128) layout padding.
    return _round_up(max(r, 1), 8) * _round_up(max(c, 1), 128) * itemsize


# ------------------- matmul + bias (+ fused ReLU) on the MXU -------------------
def _mm_single_k_kernel(a_ref, b_ref, bias_ref, o_ref, *, apply_relu):
    out = jnp.dot(a_ref[...], b_ref[...], preferred_element_type=jnp.float32)
    out = out + bias_ref[...]
    if apply_relu:
        out = jnp.maximum(out, 0.0)
    o_ref[...] = out.astype(o_ref.dtype)


def _mm_multi_k_kernel(a_ref, b_ref, bias_ref, o_ref, acc_ref, *, apply_relu):
    k = pl.program_id(2)

    @pl.when(k == 0)
    def _():
        acc_ref[...] = jnp.zeros_like(acc_ref)

    acc_ref[...] += jnp.dot(a_ref[...], b_ref[...], preferred_element_type=jnp.float32)

    @pl.when(k == pl.num_programs(2) - 1)
    def _():
        out = acc_ref[...] + bias_ref[...]
        if apply_relu:
            out = jnp.maximum(out, 0.0)
        o_ref[...] = out.astype(o_ref.dtype)


_TILE_BUDGET_BYTES = 24 * 1024 * 1024   # budget for double-buffered A + B tiles


def _choose_tiles(M, K, N):
    tm = M if M <= 1024 else 1024              # full-dim M block when small (e.g. FC M=2)
    tn = N if N <= 2048 else 2048              # lane-dense; 2048 is safe on v7x 64 MiB VMEM
    # Prefer a single K step (no accumulator, no K grid axis) when it fits the budget.
    if 2 * 4 * (tm * K + K * tn) <= _TILE_BUDGET_BYTES:
        return tm, tn, K
    # Otherwise: largest multiple-of-128 tk that divides the 128-rounded K (no extra
    # zero-padding) and fits the budget.  e.g. conv3 K=12800 -> tk=2560 (5 steps).
    kp_units = _round_up(K, 128) // 128
    cap_units = max(1, _TILE_BUDGET_BYTES // (2 * 4 * 128 * (tm + tn)))
    best = 1
    for d in range(1, kp_units + 1):
        if kp_units % d == 0 and d <= cap_units:
            best = d
    return tm, tn, 128 * best


def matmul_bias(a, b, bias, *, apply_relu=False, tiles=None):
    """a: (M, K) f32, b: (K, N) f32, bias: (N,) -> relu?(a @ b + bias) as (M, N) f32."""
    M, K = a.shape
    K2, N = b.shape
    assert K == K2 and bias.shape == (N,)
    tm, tn, tk = tiles if tiles is not None else _choose_tiles(M, K, N)

    Mp = M if tm == M else _round_up(M, tm)
    Np = N if tn == N else _round_up(N, tn)
    Kp = K if tk == K else _round_up(K, tk)
    a_p = a if (Mp, Kp) == (M, K) else jnp.pad(a, ((0, Mp - M), (0, Kp - K)))
    b_p = b if (Kp, Np) == (K, N) else jnp.pad(b, ((0, Kp - K), (0, Np - N)))
    bias_p = (bias if Np == N else jnp.pad(bias, (0, Np - N))).reshape(1, Np)

    single_k = (tk == Kp)
    # VMEM estimate: double-buffered in/out blocks (+ accumulator), with layout padding.
    est = 2 * (_aligned_bytes(tm, tk) + _aligned_bytes(tk, tn)
               + _aligned_bytes(1, tn) + _aligned_bytes(tm, tn))
    if not single_k:
        est += _aligned_bytes(tm, tn)
    vmem_limit = max(int(est) + 8 * 1024 * 1024, 16 * 1024 * 1024)

    if single_k:
        out = pl.pallas_call(
            functools.partial(_mm_single_k_kernel, apply_relu=apply_relu),
            out_shape=jax.ShapeDtypeStruct((Mp, Np), jnp.float32),
            grid_spec=pltpu.PrefetchScalarGridSpec(
                num_scalar_prefetch=0,
                grid=(Mp // tm, Np // tn),
                in_specs=[
                    pl.BlockSpec((tm, tk), lambda i, j: (i, 0)),
                    pl.BlockSpec((tk, tn), lambda i, j: (0, j)),
                    pl.BlockSpec((1, tn), lambda i, j: (0, j)),
                ],
                out_specs=pl.BlockSpec((tm, tn), lambda i, j: (i, j)),
            ),
            compiler_params=pltpu.CompilerParams(
                dimension_semantics=("parallel", "parallel"),
                vmem_limit_bytes=vmem_limit),
        )(a_p, b_p, bias_p)
    else:
        out = pl.pallas_call(
            functools.partial(_mm_multi_k_kernel, apply_relu=apply_relu),
            out_shape=jax.ShapeDtypeStruct((Mp, Np), jnp.float32),
            grid_spec=pltpu.PrefetchScalarGridSpec(
                num_scalar_prefetch=0,
                grid=(Mp // tm, Np // tn, Kp // tk),
                in_specs=[
                    pl.BlockSpec((tm, tk), lambda i, j, k: (i, k)),
                    pl.BlockSpec((tk, tn), lambda i, j, k: (k, j)),
                    pl.BlockSpec((1, tn), lambda i, j, k: (0, j)),
                ],
                out_specs=pl.BlockSpec((tm, tn), lambda i, j, k: (i, j)),
                scratch_shapes=[pltpu.VMEM((tm, tn), jnp.float32)],
            ),
            compiler_params=pltpu.CompilerParams(
                dimension_semantics=("parallel", "parallel", "arbitrary"),
                vmem_limit_bytes=vmem_limit),
        )(a_p, b_p, bias_p)

    if (Mp, Np) != (M, N):
        out = out[:M, :N]
    return out


# --------------------- fused Linear + 2-class Softmax (the hot path) ---------------------
def _fc_softmax_kernel(a_ref, b0_ref, b1_ref, bias0_ref, bias1_ref, oa_ref, ob_ref):
    a = a_ref[...]
    l0 = jnp.dot(a, b0_ref[...], preferred_element_type=jnp.float32) + bias0_ref[...]
    l1 = jnp.dot(a, b1_ref[...], preferred_element_type=jnp.float32) + bias1_ref[...]
    m = jnp.maximum(l0, l1)
    e0 = jnp.exp(l0 - m)
    e1 = jnp.exp(l1 - m)
    inv = 1.0 / (e0 + e1)
    oa_ref[...] = (e0 * inv).astype(oa_ref.dtype)
    ob_ref[...] = (e1 * inv).astype(ob_ref.dtype)


def _largest_divisor_tile(p, cap):
    best = None
    d = 128
    while d <= min(p, cap):
        if p % d == 0:
            best = d
        d += 128
    return best


def fc_softmax_two_class(feat, w_fc, bias, p, *, tn_max=2048):
    """feat: (M, K), w_fc: (K, 2p), bias: (2p,) -> (pa, pb), each (M, p) f32.

    Computes softmax([feat @ w_fc + bias].reshape(M, 2, p), axis=1) fused in one kernel.
    The (large) weight is passed twice with offset index_maps so no HBM copy/slice of it
    is ever materialized; per grid step only the two (K, tn) class tiles are streamed.
    Returns None if p has no multiple-of-128 divisor <= tn_max (caller falls back).
    """
    M, K = feat.shape
    assert w_fc.shape == (K, 2 * p) and bias.shape == (2 * p,)
    tn = _largest_divisor_tile(p, tn_max)
    if tn is None:
        return None
    half = p // tn
    bias2 = bias.reshape(1, 2 * p)

    est = 2 * (_aligned_bytes(M, K) + 2 * _aligned_bytes(K, tn)
               + 2 * _aligned_bytes(1, tn) + 2 * _aligned_bytes(M, tn))
    vmem_limit = max(int(est) + 8 * 1024 * 1024, 16 * 1024 * 1024)

    pa, pb = pl.pallas_call(
        _fc_softmax_kernel,
        out_shape=(jax.ShapeDtypeStruct((M, p), jnp.float32),
                   jax.ShapeDtypeStruct((M, p), jnp.float32)),
        grid_spec=pltpu.PrefetchScalarGridSpec(
            num_scalar_prefetch=0,
            grid=(half,),
            in_specs=[
                pl.BlockSpec((M, K), lambda j: (0, 0)),          # features (resident)
                pl.BlockSpec((K, tn), lambda j: (0, j)),         # class-0 weight tile
                pl.BlockSpec((K, tn), lambda j: (0, j + half)),  # class-1 weight tile
                pl.BlockSpec((1, tn), lambda j: (0, j)),         # class-0 bias tile
                pl.BlockSpec((1, tn), lambda j: (0, j + half)),  # class-1 bias tile
            ],
            out_specs=[pl.BlockSpec((M, tn), lambda j: (0, j)),
                       pl.BlockSpec((M, tn), lambda j: (0, j))],
        ),
        compiler_params=pltpu.CompilerParams(
            dimension_semantics=("parallel",),
            vmem_limit_bytes=vmem_limit),
    )(feat, w_fc, w_fc, bias2, bias2)
    return pa, pb


# --------------------------------- 2x2 max pool, stride 2 ---------------------------------
def _max4_kernel(a_ref, b_ref, c_ref, d_ref, o_ref):
    o_ref[...] = jnp.maximum(jnp.maximum(a_ref[...], b_ref[...]),
                             jnp.maximum(c_ref[...], d_ref[...]))


def maxpool2(x):
    """x: NHWC -> (N, H//2, W//2, C) via elementwise max-of-4 kernel (crops odd edges)."""
    N, H, W, C = x.shape
    Ho, Wo = H // 2, W // 2
    x = x[:, :2 * Ho, :2 * Wo, :]
    rows = N * Ho * Wo
    slabs = [x[:, 0::2, 0::2, :], x[:, 0::2, 1::2, :],
             x[:, 1::2, 0::2, :], x[:, 1::2, 1::2, :]]
    slabs = [s.reshape(rows, C) for s in slabs]
    rt = min(1024, _round_up(rows, 8))
    rp = _round_up(rows, rt)
    if rp != rows:
        slabs = [jnp.pad(s, ((0, rp - rows), (0, 0))) for s in slabs]
    out = pl.pallas_call(
        _max4_kernel,
        out_shape=jax.ShapeDtypeStruct((rp, C), jnp.float32),
        grid=(rp // rt,),
        in_specs=[pl.BlockSpec((rt, C), lambda i: (i, 0))] * 4,
        out_specs=pl.BlockSpec((rt, C), lambda i: (i, 0)),
        compiler_params=pltpu.CompilerParams(dimension_semantics=("parallel",)),
    )(*slabs)
    return out[:rows].reshape(N, Ho, Wo, C)


# ------------------- standalone 2-class softmax (fallback path only) -------------------
def _softmax2_kernel(a_ref, b_ref, oa_ref, ob_ref):
    a = a_ref[...]
    b = b_ref[...]
    m = jnp.maximum(a, b)
    ea = jnp.exp(a - m)
    eb = jnp.exp(b - m)
    inv = 1.0 / (ea + eb)
    oa_ref[...] = ea * inv
    ob_ref[...] = eb * inv


def softmax_two_class(a, b):
    """Elementwise 2-way softmax of two equally-shaped logit arrays (lane-dense slabs)."""
    shape = a.shape
    total = a.size
    lanes = 1024
    tp = _round_up(total, lanes)

    def prep(x):
        x = x.reshape(-1)
        if tp != total:
            x = jnp.pad(x, (0, tp - total))
        return x.reshape(tp // lanes, lanes)

    af, bf = prep(a), prep(b)
    rows = tp // lanes
    rt = rows if rows <= 1024 else 512
    rp = _round_up(rows, rt)
    if rp != rows:
        af = jnp.pad(af, ((0, rp - rows), (0, 0)))
        bf = jnp.pad(bf, ((0, rp - rows), (0, 0)))
    oa, ob = pl.pallas_call(
        _softmax2_kernel,
        out_shape=(jax.ShapeDtypeStruct((rp, lanes), jnp.float32),) * 2,
        grid=(rp // rt,),
        in_specs=[pl.BlockSpec((rt, lanes), lambda i: (i, 0))] * 2,
        out_specs=[pl.BlockSpec((rt, lanes), lambda i: (i, 0))] * 2,
        compiler_params=pltpu.CompilerParams(dimension_semantics=("parallel",)),
    )(af, bf)
    oa = oa.reshape(-1)[:total].reshape(shape)
    ob = ob.reshape(-1)[:total].reshape(shape)
    return oa, ob


# ----------------------------------- conv via im2col --------------------------------------
def conv2d_relu(x, w, b, *, stride=3, ksize=5):
    """x: NHWC, w: (kh, kw, Cin, Cout), b: (Cout,). VALID conv, stride 3, fused ReLU."""
    N, H, W, Cin = x.shape
    kh, kw, Cin2, Cout = w.shape
    assert (kh, kw, Cin2) == (ksize, ksize, Cin)
    Ho = (H - ksize) // stride + 1
    Wo = (W - ksize) // stride + 1
    cols = []
    for di in range(ksize):
        for dj in range(ksize):
            cols.append(x[:, di:di + stride * (Ho - 1) + 1:stride,
                          dj:dj + stride * (Wo - 1) + 1:stride, :])
    # TODO(synk): im2col gather is still done in XLA; an in-kernel 25-tap accumulation
    # would save one HBM round trip on the activations (secondary to the FC cost).
    patches = jnp.stack(cols, axis=3).reshape(N * Ho * Wo, ksize * ksize * Cin)
    w_mat = w.reshape(ksize * ksize * Cin, Cout)
    y = matmul_bias(patches, w_mat, b, apply_relu=True)
    return y.reshape(N, Ho, Wo, Cout)


# --------------------------------------- model --------------------------------------------
# Full-size configuration == the PyTorch BaselineModel exactly.
FULL_CONFIG = dict(channels=(3, 128, 512, 1024), num_classes=2, out_hw=(320, 320),
                   in_hw=(302, 302))
# Scaled-down configuration for the quick self-test (same op graph: 3x(conv5/3+ReLU+pool2),
# Flatten, Linear, Unflatten, Softmax(dim=1)).  Spatial 302 is forced by the conv geometry.
DEMO_CONFIG = dict(channels=(3, 8, 16, 32), num_classes=2, out_hw=(16, 16),
                   in_hw=(302, 302))


def init_params(key, cfg):
    c0, c1, c2, c3 = cfg["channels"]
    oh, ow = cfg["out_hw"]
    out_features = cfg["num_classes"] * oh * ow
    ks = jax.random.split(key, 8)

    def uniform(k, shape, bound):
        return jax.random.uniform(k, shape, jnp.float32, -bound, bound)

    def xavier_uniform(k, shape):                       # shape = (kh, kw, Cin, Cout)
        fan_in = shape[0] * shape[1] * shape[2]
        fan_out = shape[0] * shape[1] * shape[3]
        return uniform(k, shape, (6.0 / (fan_in + fan_out)) ** 0.5)

    def torch_default(kw_, kb_, shape, fan_in):
        # PyTorch Conv2d/Linear default: kaiming_uniform_(a=sqrt(5)) == U(+-1/sqrt(fan_in))
        bound = 1.0 / fan_in ** 0.5
        return uniform(kw_, shape, bound), uniform(kb_, (shape[-1],), bound)

    w1 = xavier_uniform(ks[0], (5, 5, c0, c1))          # conv1 weight: xavier (per spec)
    b1 = uniform(ks[1], (c1,), 1.0 / (5 * 5 * c0) ** 0.5)
    w2, b2 = torch_default(ks[2], ks[3], (5, 5, c1, c2), 5 * 5 * c1)
    w3, b3 = torch_default(ks[4], ks[5], (5, 5, c2, c3), 5 * 5 * c2)
    w_fc, b_fc = torch_default(ks[6], ks[7], (c3, out_features), c3)
    return dict(w1=w1, b1=b1, w2=w2, b2=b2, w3=w3, b3=b3, w_fc=w_fc, b_fc=b_fc)


def baseline_forward(params, x_nchw, out_hw):
    """Pallas forward pass. x_nchw: (N, Cin, H, W) -> (N, 2, oh, ow) class probabilities."""
    n = x_nchw.shape[0]
    oh, ow = out_hw
    p = oh * ow
    x = jnp.transpose(x_nchw, (0, 2, 3, 1)).astype(jnp.float32)    # NCHW -> NHWC
    x = maxpool2(conv2d_relu(x, params["w1"], params["b1"]))
    x = maxpool2(conv2d_relu(x, params["w2"], params["b2"]))
    x = maxpool2(conv2d_relu(x, params["w3"], params["b3"]))
    feat = x.reshape(n, -1)                                        # Flatten (spatial is 1x1)
    fused = fc_softmax_two_class(feat, params["w_fc"], params["b_fc"], p)
    if fused is not None:
        pa, pb = fused                                             # Linear + Softmax fused
    else:
        logits = matmul_bias(feat, params["w_fc"], params["b_fc"])
        pa, pb = softmax_two_class(logits[:, :p], logits[:, p:])
    return jnp.stack([pa.reshape(n, oh, ow),                       # Unflatten (N, 2, oh, ow)
                      pb.reshape(n, oh, ow)], axis=1)


def reference_forward(params, x_nchw, out_hw):
    """Pure-JAX reference (for correctness checks only)."""
    x = jnp.transpose(x_nchw, (0, 2, 3, 1)).astype(jnp.float32)

    def conv(x, w, b):
        y = jax.lax.conv_general_dilated(
            x, w, window_strides=(3, 3), padding="VALID",
            dimension_numbers=("NHWC", "HWIO", "NHWC"))
        return jnp.maximum(y + b, 0.0)

    def pool(x):
        return jax.lax.reduce_window(x, -jnp.inf, jax.lax.max,
                                     (1, 2, 2, 1), (1, 2, 2, 1), "VALID")

    x = pool(conv(x, params["w1"], params["b1"]))
    x = pool(conv(x, params["w2"], params["b2"]))
    x = pool(conv(x, params["w3"], params["b3"]))
    n = x.shape[0]
    logits = x.reshape(n, -1) @ params["w_fc"] + params["b_fc"]
    oh, ow = out_hw
    return jax.nn.softmax(logits.reshape(n, 2, oh, ow), axis=1)


if __name__ == "__main__":
    key = jax.random.PRNGKey(0)

    # 1) Standalone check of the K-tiled (accumulator) matmul path.
    k1, k2, key = jax.random.split(key, 3)
    a = jax.random.normal(k1, (16, 512), jnp.float32)
    bm = jax.random.normal(k2, (512, 256), jnp.float32)
    bias = jnp.arange(256, dtype=jnp.float32) * 0.01
    y = jax.block_until_ready(matmul_bias(a, bm, bias, apply_relu=True, tiles=(16, 256, 128)))
    y_ref = jnp.maximum(a @ bm + bias, 0.0)
    rel_err = float(jnp.max(jnp.abs(y - y_ref)) / (jnp.max(jnp.abs(y_ref)) + 1e-6))
    assert rel_err < 2e-2, rel_err

    # 2) Scaled-down BaselineModel forward (same op graph, small channels / output).
    cfg = DEMO_CONFIG
    pkey, xkey = jax.random.split(key)
    params = init_params(pkey, cfg)
    h, w = cfg["in_hw"]
    x = jax.random.normal(xkey, (2, cfg["channels"][0], h, w), jnp.float32)

    fwd = jax.jit(functools.partial(baseline_forward, out_hw=cfg["out_hw"]))
    out = jax.block_until_ready(fwd(params, x))
    oh, ow = cfg["out_hw"]
    assert out.shape == (2, 2, oh, ow), out.shape
    assert out.dtype == jnp.float32
    sums = jnp.sum(out, axis=1)                       # softmax over dim=1 must sum to 1
    assert bool(jnp.all(jnp.abs(sums - 1.0) < 1e-4))
    ref = reference_forward(params, x, cfg["out_hw"])
    assert float(jnp.max(jnp.abs(out - ref))) < 5e-2

    # 3) Optional: full PyTorch-sized model (Conv 3->128->512->1024, Linear 1024->204800).
    #    Off by default so the self-test stays fast; enable on a real TPU to exercise the
    #    fused FC+softmax tiling (full-K=1024, tn=2048, 50 grid steps over 839 MB weight).
    if os.environ.get("RUN_FULL_BASELINE", "0") == "1":
        cfg = FULL_CONFIG
        pkey, xkey = jax.random.split(jax.random.PRNGKey(1))
        params = init_params(pkey, cfg)
        x = jax.random.normal(xkey, (2, 3, 302, 302), jnp.float32)
        fwd = jax.jit(functools.partial(baseline_forward, out_hw=cfg["out_hw"]))
        out_full = jax.block_until_ready(fwd(params, x))
        assert out_full.shape == (2, 2, 320, 320)

    print("KERNEL_OK")
</pallas_src>

<mosaic_0001>
module attributes {stable_mosaic.version = 11 : i64} {
  func.func @_mm_multi_k_kernel(%arg0: i32, %arg1: i32, %arg2: i32, %arg3: memref<16x128xf32, #tpu.memory_space<vmem>>, %arg4: memref<128x256xf32, #tpu.memory_space<vmem>>, %arg5: memref<1x256xf32, #tpu.memory_space<vmem>>, %arg6: memref<16x256xf32, #tpu.memory_space<vmem>>, %arg7: memref<16x256xf32, #tpu.memory_space<vmem>>) attributes {dimension_semantics = [#tpu.dimension_semantics<parallel>, #tpu.dimension_semantics<parallel>, #tpu.dimension_semantics<arbitrary>], iteration_bounds = array<i64: 1, 1, 4>, scalar_prefetch = 0 : i64, scratch_operands = 1 : i64, tpu.core_type = #tpu.core_type<tc>, window_params = [{transform_indices = @transform_0, window_bounds = array<i64: 16, 128>}, {transform_indices = @transform_1, window_bounds = array<i64: 128, 256>}, {transform_indices = @transform_2, window_bounds = array<i64: 1, 256>}, {transform_indices = @transform_3, window_bounds = array<i64: 16, 256>}]} {
    %c0_i32 = arith.constant 0 : i32
    %0 = arith.cmpi eq, %arg2, %c0_i32 : i32
    %1 = arith.extui %0 : i1 to i32
    %c0_i32_0 = arith.constant 0 : i32
    %2 = arith.cmpi ne, %1, %c0_i32_0 : i32
    scf.if %2 {
      %cst_9 = arith.constant 0.000000e+00 : f32
      %12 = vector.broadcast %cst_9 : f32 to vector<16x256xf32>
      %c0_10 = arith.constant 0 : index
      %c0_11 = arith.constant 0 : index
      %13 = vector.load %arg7[%c0_10, %c0_11] : memref<16x256xf32, #tpu.memory_space<vmem>>, vector<16x256xf32>
      tpu.vector_store %arg7[%c0_10, %c0_11], %12 {strides = array<i32>} : memref<16x256xf32, #tpu.memory_space<vmem>>, vector<16x256xf32>,
    } else {
    }
    %c0 = arith.constant 0 : index
    %c0_1 = arith.constant 0 : index
    %3 = vector.load %arg7[%c0, %c0_1] : memref<16x256xf32, #tpu.memory_space<vmem>>, vector<16x256xf32>
    %c0_2 = arith.constant 0 : index
    %c0_3 = arith.constant 0 : index
    %4 = vector.load %arg3[%c0_2, %c0_3] : memref<16x128xf32, #tpu.memory_space<vmem>>, vector<16x128xf32>
    %c0_4 = arith.constant 0 : index
    %c0_5 = arith.constant 0 : index
    %5 = vector.load %arg4[%c0_4, %c0_5] : memref<128x256xf32, #tpu.memory_space<vmem>>, vector<128x256xf32>
    %cst = arith.constant dense<0.000000e+00> : vector<16x256xf32>
    %6 = tpu.matmul %4, %5, %cst {dimension_numbers = #tpu.dot_dimension_numbers<[1], [0], [0], [1], [0, 0, 1, 1], [], []>} : vector<16x128xf32>, vector<128x256xf32>, vector<16x256xf32> -> vector<16x256xf32>
    %7 = arith.addf %3, %6 : vector<16x256xf32>
    %c0_6 = arith.constant 0 : index
    %c0_7 = arith.constant 0 : index
    %8 = vector.load %arg7[%c0_6, %c0_7] : memref<16x256xf32, #tpu.memory_space<vmem>>, vector<16x256xf32>
    tpu.vector_store %arg7[%c0_6, %c0_7], %7 {strides = array<i32>} : memref<16x256xf32, #tpu.memory_space<vmem>>, vector<16x256xf32>,
    %c3_i32 = arith.constant 3 : i32
    %9 = arith.cmpi eq, %arg2, %c3_i32 : i32
    %10 = arith.extui %9 : i1 to i32
    %c0_i32_8 = arith.constant 0 : i32
    %11 = arith.cmpi ne, %10, %c0_i32_8 : i32
    scf.if %11 {
      %c0_9 = arith.constant 0 : index
      %c0_10 = arith.constant 0 : index
      %12 = vector.load %arg7[%c0_9, %c0_10] : memref<16x256xf32, #tpu.memory_space<vmem>>, vector<16x256xf32>
      %c0_11 = arith.constant 0 : index
      %c0_12 = arith.constant 0 : index
      %13 = vector.load %arg5[%c0_11, %c0_12] : memref<1x256xf32, #tpu.memory_space<vmem>>, vector<1x256xf32>
      %14 = vector.broadcast %13 : vector<1x256xf32> to vector<16x256xf32>
      %15 = arith.addf %12, %14 : vector<16x256xf32>
      %cst_13 = arith.constant 0.000000e+00 : f32
      %16 = vector.broadcast %cst_13 : f32 to vector<16x256xf32>
      %17 = arith.maximumf %15, %16 : vector<16x256xf32>
      %c0_14 = arith.constant 0 : index
      %c0_15 = arith.constant 0 : index
      %18 = vector.load %arg6[%c0_14, %c0_15] : memref<16x256xf32, #tpu.memory_space<vmem>>, vector<16x256xf32>
      tpu.vector_store %arg6[%c0_14, %c0_15], %17 {strides = array<i32>} : memref<16x256xf32, #tpu.memory_space<vmem>>, vector<16x256xf32>,
    } else {
    }
    return
  }
  func.func @transform_0(%arg0: i32, %arg1: i32, %arg2: i32) -> (i32, i32) {
    %c0_i32 = arith.constant 0 : i32
    return %arg0, %arg2 : i32, i32
  }
  func.func @transform_1(%arg0: i32, %arg1: i32, %arg2: i32) -> (i32, i32) {
    %c0_i32 = arith.constant 0 : i32
    return %arg2, %arg1 : i32, i32
  }
  func.func @transform_2(%arg0: i32, %arg1: i32, %arg2: i32) -> (i32, i32) {
    %c0_i32 = arith.constant 0 : i32
    %c0_i32_0 = arith.constant 0 : i32
    return %c0_i32, %arg1 : i32, i32
  }
  func.func @transform_3(%arg0: i32, %arg1: i32, %arg2: i32) -> (i32, i32) {
    %c0_i32 = arith.constant 0 : i32
    return %arg0, %arg1 : i32, i32
  }
}

</mosaic_0001>

<bundles_post_ra>
// kernel: tpu_custom_call.1
= control target key start
LH: loop header
LB: loop body
LE: loop exit
PB: predicated region body
PF: predicated region fallthrough
CT: control target
= control target key end

     0   :  { %8 = vsyncpa [#allocation4], 0  ;;  %s1126_s0 = inlined_call_operand.hbm [shape: f32[16,512], index: 0, kind: input, shape index: {}]   ;;  %s1127_s1 = inlined_call_operand.hbm [shape: f32[512,256], index: 1, kind: input, shape index: {}]   ;;  %s1128_s2 = inlined_call_operand.vmem [shape: f32[1,256], index: 2, kind: input, shape index: {}]   ;;  %s1129_s3 = inlined_call_operand.hbm [shape: f32[16,256], index: 3, kind: output, shape index: {}]  }
   0x1   :  { %10 = vsyncpa [#allocation4 + $0x1], 0 }
   0x2   :  { %11 = vsyncpa [#allocation7], 0 }
   0x3   :  { %13 = vsyncpa [#allocation7 + $0x1], 0 }
   0x4   :  { %14 = vsyncpa [#allocation5], 0  ;;  %s884_s12 = smov 0   ;;  %s886_s13 = smov 0  }
   0x5   :  { %s888_s14 = smov 0   ;;  %s890_s15 = smov 0  }
   0x6   :  { %s892_s16 = smov 0   ;;  %s894_s17 = smov 0  }
   0x7 LB: > { %s561_s18 = sadd.s32 4294967295, %s850_s17   ;;  %s32_s19 = sadd.s32 1, %s846_s16  ;;  %s850_s17 = sphi %s894_s17, %s20_s17   ;;  %s846_s16 = sphi %s892_s16, %s1142_s16   ;;  %s842_s15 = sphi %s890_s15, %s1141_s15   ;;  %s838_s14 = sphi %s888_s14, %s1140_s14   ;;  %s834_s13 = sphi %s886_s13, %s1139_s13   ;;  %s830_s12 = sphi %s884_s12, %s1138_s12  }
   0x8   : > { %p33_p0 = scmp.ge.s32.totalorder %s32_s19, 4  ;;  %s48_s20 = sadd.s32 1, %s838_s14 }
   0x9   : > { %p55_p1 = scmp.ne.s32.totalorder %s838_s14, %s834_s13  ;;  %p56_p2 = scmp.eq.s32.totalorder %s850_s17, 0 }
   0xa   : > { %s1144_s19 = smov (%p33_p0, %s32_s19), 0  ;;  %p61_p4 = scmp.ne.s32.totalorder %s834_s13, %s830_s12 }
   0xb   : > { %p920_p3 = por %p56_p2, %p55_p1  ;;  %s44_s22 = ssub.s32 %s846_s16, %s1144_s19 }
   0xc   : > { %p62_p5 = scmp.eq.s32.totalorder %s561_s18, 0  ;;  %p46_p6 = scmp.eq.s32.totalorder %s44_s22, 0 }
   0xd   : > { %p645_p8 = scmp.lt.s32.totalorder %s850_s17, 4  ;;  %s938_s25 = sand.u32 1, %s838_s14  }
   0xe   : > { %p929_p7 = por %p62_p5, %p61_p4  ;;  %s566_s26 = sshll.u32 %s846_s16, 7 }
   0xf   : > { %s935_s24 = scalar_select %p46_p6, %s838_s14, %s48_s20  }
  0x10   : > { %s1132_s23 = scalar_select %p929_p7, 1, 0 }
  0x11   : > { %s565_s27 = sshll.u32 %s938_s25, 4  ;;  %s945_s30 = scalar_lea.hbm %s1126_s0, %s566_s26 }
  0x12   : > { %s179_s4 = scalar_lea.vmem [#allocation3], %s565_s27  ;;  %p949_p9 = pnand %p645_p8, %p920_p3 }
  0x13   : > { %s188_s5 = sshll.u32 %s179_s4, 4  ;;  %s176_s7 = scalar_lea.sflag [#allocation4], %s938_s25  ;;  %s953_s5 = int_to_ptr.vmem [resolvable:$true] %s188_s5 }
  0x14   : > { %s706_s8 = scalar_lea.hbm %s945_s30, 256  ;;  %p708_p12 = pneg %p949_p9 }
  0x15   : > { %p707_p11 = scmp.ne.s32.totalorder %s945_s30, %s706_s8  ;;  %s711_s11 = scalar_lea.hbm %s1126_s0, 1024 }
  0x16   : > { %p712_p1 = scmp.lt.u32.totalorder %s945_s30, %s1126_s0  ;;  %p713_p2 = scmp.lt.u32.totalorder %s711_s11, %s706_s8 }
  0x17   : > { %p709_p13 = pnand %p708_p12, %p707_p11  ;;  %p715_p4 = scmp.lt.u32.totalorder %s706_s8, %s945_s30 }
  0x18   : > { %p714_p3 = por %p713_p2, %p712_p1 }
  0x19   : > { %p710_p0 = pneg %p709_p13 }
  0x1a   : > { %p716_p5 = por %p715_p4, %p714_p3 }
  0x1c   : > { %p717_p6 = pnand %p716_p5, %p710_p0 }
  0x1e   : > { %720 = shalt.err (!%p717_p6)
}
  0x1f   : > { %s721_s21 = scalar_lea.vmem %s953_s5, 256  ;;  %s852_s22 = smov [#allocation3]  }
  0x20   : > { %p722_p8 = scmp.ne.s32.totalorder %s953_s5, %s721_s21  ;;  %s726_s26 = sshll.u32 %s852_s22, 4  ;;  %s727_s26 = int_to_ptr.vmem [resolvable:$false] %s726_s26 }
  0x21   : > { %s728_s27 = scalar_lea.vmem %s727_s26, 512  ;;  %p729_p10 = scmp.lt.s32.totalorder %s953_s5, %s727_s26 }
  0x22   : > { %p724_p11 = pnand %p722_p8, %p708_p12  ;;  %p730_p1 = scmp.lt.s32.totalorder %s728_s27, %s721_s21 }
  0x24   : > { %p725_p13 = pneg %p724_p11  ;;  %p731_p2 = por %p730_p1, %p729_p10 }
  0x26   : > { %p732_p3 = pnand %p731_p2, %p725_p13 }
  0x28   : > { %735 = shalt.err (!%p732_p3)
}
  0x29   : > { %s853_s28 = smov 512   ;;  %s854_s29 = smov 128  }
  0x2a   : > { %s855_s4 = smov 8   ;;  %p220_p0 = scmp.lt.s32.totalorder %s850_s17, 5 }
  0x2b   : > { %641 = dma.hbm_to_vmem [thread:$0]  (!%p949_p9), %s945_s30, 256, %s953_s5, %s176_s7, %s853_s28, %s854_s29, %s855_s4  }
  0x2c   : > { %s567_s8 = sshll.u32 %s938_s25, 8  ;;  %s581_s9 = sshll.u32 %s846_s16, 12 }
  0x2d   : > { %p1134_p10 = scmp.ge.s32.totalorder %s850_s17, 1  ;;  %s996_s20 = scalar_lea.hbm %s1127_s1, %s581_s9 }
  0x2e   : > { %s202_s21 = scalar_lea.vmem [#allocation6], %s567_s8  ;;  %s199_s30 = scalar_lea.sflag [#allocation7], %s938_s25 }
  0x2f   : > { %p989_p4 = pnand %p1134_p10, %p220_p0  ;;  %s212_s22 = sshll.u32 %s202_s21, 4  ;;  %s998_s22 = int_to_ptr.vmem [resolvable:$true] %s212_s22 }
  0x30   : > { %s736_s5 = scalar_lea.hbm %s996_s20, 4096  ;;  %s741_s27 = scalar_lea.hbm %s1127_s1, 16384 }
  0x31   : > { %p737_p5 = scmp.ne.s32.totalorder %s996_s20, %s736_s5  ;;  %p742_p11 = scmp.lt.u32.totalorder %s996_s20, %s1127_s1 }
  0x32   : > { %p743_p13 = scmp.lt.u32.totalorder %s741_s27, %s736_s5  ;;  %p745_p2 = scmp.lt.u32.totalorder %s736_s5, %s996_s20 }
  0x33   : > { %p739_p6 = pnand %p737_p5, %p708_p12 }
  0x34   : > { %p744_p1 = por %p743_p13, %p742_p11 }
  0x35   : > { %p740_p8 = pneg %p739_p6 }
  0x36   : > { %p746_p3 = por %p745_p2, %p744_p1 }
  0x38   : > { %p747_p0 = pnand %p746_p3, %p740_p8 }
  0x3a   : > { %750 = shalt.err (!%p747_p0)
}
  0x3b   : > { %s751_s4 = scalar_lea.vmem %s998_s22, 4096  ;;  %s856_s8 = smov [#allocation6]  }
  0x3c   : > { %p752_p10 = scmp.ne.s32.totalorder %s998_s22, %s751_s4  ;;  %s756_s9 = sshll.u32 %s856_s8, 4  ;;  %s757_s9 = int_to_ptr.vmem [resolvable:$false] %s756_s9 }
  0x3d   : > { %s758_s11 = scalar_lea.vmem %s757_s9, 8192  ;;  %p759_p7 = scmp.lt.s32.totalorder %s998_s22, %s757_s9 }
  0x3e   : > { %p754_p5 = pnand %p752_p10, %p708_p12  ;;  %p760_p11 = scmp.lt.s32.totalorder %s758_s11, %s751_s4 }
  0x40   : > { %p755_p6 = pneg %p754_p5  ;;  %p761_p13 = por %p760_p11, %p759_p7 }
  0x42   : > { %p762_p1 = pnand %p761_p13, %p755_p6 }
  0x44   : > { %765 = shalt.err (!%p762_p1)
}
  0x45   : > { %s857_s12 = smov 256   ;;  %s858_s21 = smov 16  }
  0x46   : > { %644 = dma.hbm_to_vmem [thread:$0]  (!%p949_p9), %s996_s20, 4096, %s998_s22, %s199_s30, %s857_s12, %s857_s12, %s858_s21  }
  0x47   : > { %224 = sbr.rel (%p989_p4) target bundleno = 380 (0x17c), region = 32  ;;  %s226_s5 = sand.u32 (!%p989_p4), 1, %s834_s13  }
  0x48   : > { %s572_s7 = sshll.u32 (!%p989_p4), %s226_s5, 4  ;;  %s227_s26 = scalar_lea.sflag (!%p989_p4), [#allocation4], %s226_s5 }
  0x49   : > { %s1029_s27 = scalar_lea.vmem (!%p989_p4), [#allocation3], %s572_s7  ;;  %p1136_p7 = scmp.ne.s32.totalorder (!%p989_p4), %s1132_s23, 0 }
  0x4e   : > { %817 = dma.done.wait (%p1136_p7), %s227_s26, 256  }
  0x4f   : > { %819 = vsyncadd (%p1136_p7), %s227_s26, 4294967040  ;;  %s573_s28 = sshll.u32 %s226_s5, 8  ;;  %s236_s6 = scalar_lea.sflag [#allocation7], %s226_s5 }
  0x50   : > { %s1035_s25 = scalar_lea.vmem [#allocation6], %s573_s28 }
  0x51   : > { %821 = dma.done.wait (%p1136_p7), %s236_s6, 4096  }
  0x52   : > { %823 = vsyncadd (%p1136_p7), %s236_s6, 4294963200  ;;  %p574_p9 = scmp.ne.s32.totalorder %s842_s15, 0 }
  0x53   : > { %v859_v0 = vmov (!%p574_p9), 0.0  }
  0x54   : > { %279 = sbr.rel (%p574_p9) target bundleno = 91 (0x5b), region = 44  ;;  %280 = vst [vmem:[#allocation2] sm:$0xff] (!%p574_p9), %v859_v0  ;;  %281 = vst [vmem:[#allocation2 + $0x8] sm:$0xff] (!%p574_p9), %v859_v0 }
  0x55   : > { %282 = vst [vmem:[#allocation2 + $0x10] sm:$0xff] (!%p574_p9), %v859_v0  ;;  %283 = vst [vmem:[#allocation2 + $0x18] sm:$0xff] (!%p574_p9), %v859_v0 }
  0x5b PF: > { %v291_v1 = vld [vmem:[%s1035_s25 + $0x8] sm:$0xff]  ;;  %v293_v2 = vld [vmem:[%s1035_s25 + $0x18] sm:$0xff]  ;;  %v290_v3 = vld [vmem:[%s1035_s25] sm:$0xff]  ;;  %v860_v8 = vmov 0.0   ;;  %p575_p12 = scmp.ne.s32.totalorder %s842_s15, 3 }
  0x5c   : > { %v582_v4 = vpack.c.bf16 %v293_v2, %v291_v1  ;;  %v292_v5 = vld [vmem:[%s1035_s25 + $0x10] sm:$0xff]  ;;  %v295_v6 = vld [vmem:[%s1035_s25 + $0x28] sm:$0xff]  ;;  %v297_v7 = vld [vmem:[%s1035_s25 + $0x38] sm:$0xff]  ;;  %386 = vmatprep.mubr.f32.mxu0 %v860_v8  ;;  %392 = vmatprep.mubr.f32.mxu1 %v860_v8  ;;  %v417_v0 = vlaneseq (!%p575_p12) }
  0x5d   : > { %v584_v9 = vpack.c.bf16 %v292_v5, %v290_v3  ;;  %v586_v10 = vpack.c.bf16 %v297_v7, %v295_v6  ;;  %v294_v11 = vld [vmem:[%s1035_s25 + $0x20] sm:$0xff]  ;;  %v296_v12 = vld [vmem:[%s1035_s25 + $0x30] sm:$0xff]  ;;  %v299_v13 = vld [vmem:[%s1035_s25 + $0x48] sm:$0xff] }
  0x5e   : > { %583 = vmatprep.subr.bf16.mxu0 %v582_v4  ;;  %614 = vmatprep.subr.bf16.mxu1 %v582_v4  ;;  %v301_v14 = vld [vmem:[%s1035_s25 + $0x58] sm:$0xff]  ;;  %v588_v15 = vpack.c.bf16 %v296_v12, %v294_v11  ;;  %v298_v17 = vld [vmem:[%s1035_s25 + $0x40] sm:$0xff]  ;;  %v300_v18 = vld [vmem:[%s1035_s25 + $0x50] sm:$0xff]  ;;  %v418_v1 = vshrl.u32 (!%p575_p12), %v417_v0, 7 }
  0x5f   : > { %585 = vmatpush1.bf16.msra.mxu0 %v584_v9  ;;  %622 = vmatpush1.bf16.msra.mxu1 %v584_v9  ;;  %v590_v16 = vpack.c.bf16 %v301_v14, %v299_v13  ;;  %v303_v19 = vld [vmem:[%s1035_s25 + $0x68] sm:$0xff]  ;;  %v305_v20 = vld [vmem:[%s1035_s25 + $0x78] sm:$0xff]  ;;  %v592_v21 = vpack.c.bf16 %v300_v18, %v298_v17  ;;  %v302_v23 = vld [vmem:[%s1035_s25 + $0x60] sm:$0xff] }
  0x60   : > { %587 = vmatprep.subr.bf16.mxu0 %v586_v10  ;;  %615 = vmatprep.subr.bf16.mxu1 %v586_v10  ;;  %v594_v22 = vpack.c.bf16 %v305_v20, %v303_v19  ;;  %v304_v24 = vld [vmem:[%s1035_s25 + $0x70] sm:$0xff]  ;;  %v307_v25 = vld [vmem:[%s1035_s25 + $0x88] sm:$0xff]  ;;  %v309_v26 = vld [vmem:[%s1035_s25 + $0x98] sm:$0xff]  ;;  %v419_v4 = vsub.s32 (!%p575_p12), 0, %v418_v1  ;;  %v423_v5 = vsub.s32 (!%p575_p12), 1, %v418_v1 }
  0x61   : > { %v596_v27 = vpack.c.bf16 %v304_v24, %v302_v23  ;;  %v598_v28 = vpack.c.bf16 %v309_v26, %v307_v25  ;;  %v306_v29 = vld [vmem:[%s1035_s25 + $0x80] sm:$0xff]  ;;  %v308_v30 = vld [vmem:[%s1035_s25 + $0x90] sm:$0xff]  ;;  %v311_v31 = vld [vmem:[%s1035_s25 + $0xa8] sm:$0xff] }
  0x62   : > { %v313_v32 = vld [vmem:[%s1035_s25 + $0xb8] sm:$0xff]  ;;  %v600_v33 = vpack.c.bf16 %v308_v30, %v306_v29  ;;  %v310_v35 = vld [vmem:[%s1035_s25 + $0xa0] sm:$0xff]  ;;  %v312_v36 = vld [vmem:[%s1035_s25 + $0xb0] sm:$0xff] }
  0x63   : > { %589 = vmatpush1.bf16.msra.mxu0 %v588_v15  ;;  %623 = vmatpush1.bf16.msra.mxu1 %v588_v15  ;;  %v602_v34 = vpack.c.bf16 %v313_v32, %v311_v31  ;;  %v315_v37 = vld [vmem:[%s1035_s25 + $0xc8] sm:$0xff]  ;;  %v317_v38 = vld [vmem:[%s1035_s25 + $0xd8] sm:$0xff]  ;;  %v604_v39 = vpack.c.bf16 %v312_v36, %v310_v35  ;;  %v314_v41 = vld [vmem:[%s1035_s25 + $0xc0] sm:$0xff] }
  0x64   : > { %591 = vmatprep.subr.bf16.mxu0 %v590_v16  ;;  %616 = vmatprep.subr.bf16.mxu1 %v590_v16  ;;  %v606_v40 = vpack.c.bf16 %v317_v38, %v315_v37  ;;  %v316_v42 = vld [vmem:[%s1035_s25 + $0xd0] sm:$0xff]  ;;  %v319_v43 = vld [vmem:[%s1035_s25 + $0xe8] sm:$0xff]  ;;  %v321_v44 = vld [vmem:[%s1035_s25 + $0xf8] sm:$0xff] }
  0x65   : > { %v608_v45 = vpack.c.bf16 %v316_v42, %v314_v41  ;;  %v610_v46 = vpack.c.bf16 %v321_v44, %v319_v43  ;;  %v318_v47 = vld [vmem:[%s1035_s25 + $0xe0] sm:$0xff]  ;;  %v320_v48 = vld [vmem:[%s1035_s25 + $0xf0] sm:$0xff]  ;;  %v289_v51 = vld [vmem:[%s1029_s27 + $0x8] sm:$0xff] }
  0x66   : > { %v612_v49 = vpack.c.bf16 %v320_v48, %v318_v47  ;;  %v288_v50 = vld [vmem:[%s1029_s27] sm:$0xff]  ;;  %v285_v54 = vld [vmem:[#allocation2 + $0x8] sm:$0xff]  ;;  %v287_v55 = vld [vmem:[#allocation2 + $0x18] sm:$0xff] }
  0x67   : > { %593 = vmatpush1.bf16.msra.mxu0 %v592_v21  ;;  %624 = vmatpush1.bf16.msra.mxu1 %v592_v21  ;;  %v284_v52 = vld [vmem:[#allocation2] sm:$0xff]  ;;  %v286_v53 = vld [vmem:[#allocation2 + $0x10] sm:$0xff] }
  0x68   : > { %595 = vmatprep.subr.bf16.mxu0 %v594_v22  ;;  %617 = vmatprep.subr.bf16.mxu1 %v594_v22  ;;  %v415_v2 = vld [vmem:[%s1128_s2] sm:$0x3] (!%p575_p12) }
  0x69   : > { %v420_v9 = vrot.slane (!%p575_p12), %v415_v2, %v419_v4  ;;  %v424_v10 = vrot.slane (!%p575_p12), %v415_v2, %v423_v5 }
  0x6b   : > { %597 = vmatpush1.bf16.msra.mxu0 %v596_v27  ;;  %625 = vmatpush1.bf16.msra.mxu1 %v596_v27 }
  0x6c   : > { %599 = vmatprep.subr.bf16.mxu0 %v598_v28  ;;  %618 = vmatprep.subr.bf16.mxu1 %v598_v28 }
  0x6f   : > { %601 = vmatpush1.bf16.msra.mxu0 %v600_v33  ;;  %626 = vmatpush1.bf16.msra.mxu1 %v600_v33 }
  0x70   : > { %603 = vmatprep.subr.bf16.mxu0 %v602_v34  ;;  %619 = vmatprep.subr.bf16.mxu1 %v602_v34 }
  0x73   : > { %605 = vmatpush1.bf16.msra.mxu0 %v604_v39  ;;  %627 = vmatpush1.bf16.msra.mxu1 %v604_v39 }
  0x74   : > { %607 = vmatprep.subr.bf16.mxu0 %v606_v40  ;;  %620 = vmatprep.subr.bf16.mxu1 %v606_v40 }
  0x77   : > { %609 = vmatpush1.bf16.msra.mxu0 %v608_v45  ;;  %628 = vmatpush1.bf16.msra.mxu1 %v608_v45 }
  0x78   : > { %611 = vmatprep.subr.bf16.mxu0 %v610_v46  ;;  %621 = vmatprep.subr.bf16.mxu1 %v610_v46 }
  0x7b   : > { %613 = vmatpush1.bf16.msra.mxu0 %v612_v49  ;;  %629 = vmatpush1.bf16.msra.mxu1 %v612_v49 }
  0x7e   : > { %387 = vmatmul.mubr.f32.vlgmr.msra.gmra.mrb[0].mxu0 %v288_v50  ;;  %393 = vmatmul.mubr.f32.vlgmr.msra.gmra.mrb[0].mxu1 %v289_v51 }
 0x14f   : > { %410 = sbr.rel (%p575_p12) target bundleno = 354 (0x162), region = 48 }
 0x151   : > { %v388_v56 = vpop.f32.mrb[0].mxu0  ;;  %v394_v57 = vpop.f32.mrb[0].mxu1 }
 0x152   : > { %v399_v58 = vadd.f32 %v388_v56, %v284_v52  ;;  %v401_v59 = vadd.f32 %v394_v57, %v286_v53  ;;  %v390_v60 = vpop.f32.mrb[1].mxu0  ;;  %v396_v61 = vpop.f32.mrb[1].mxu1 }
 0x153   : > { %v400_v62 = vadd.f32 %v390_v60, %v285_v54  ;;  %v402_v63 = vadd.f32 %v396_v61, %v287_v55 }
 0x154   : > { %403 = vst [vmem:[#allocation2] sm:$0xff] %v399_v58  ;;  %405 = vst [vmem:[#allocation2 + $0x10] sm:$0xff] %v401_v59 }
 0x155   : > { %404 = vst [vmem:[#allocation2 + $0x8] sm:$0xff] %v400_v62  ;;  %406 = vst [vmem:[#allocation2 + $0x18] sm:$0xff] %v402_v63 }
 0x15b   : > { %v411_v3 = vld [vmem:[#allocation2] sm:$0xff]  ;;  %v413_v7 = vld [vmem:[#allocation2 + $0x10] sm:$0xff] }
 0x15c   : > { %v412_v6 = vld [vmem:[#allocation2 + $0x8] sm:$0xff]  ;;  %v414_v8 = vld [vmem:[#allocation2 + $0x18] sm:$0xff]  ;;  %v427_v11 = vadd.f32 %v420_v9, %v411_v3  ;;  %v429_v13 = vadd.f32 %v420_v9, %v413_v7 }
 0x15d   : > { %v428_v12 = vadd.f32 %v424_v10, %v412_v6  ;;  %v430_v14 = vadd.f32 %v424_v10, %v414_v8 }
 0x15e   : > { %v431_v15 = vmax.f32 %v427_v11, 0.0  ;;  %v433_v17 = vmax.f32 %v429_v13, 0.0 }
 0x15f   : > { %v432_v16 = vmax.f32 %v428_v12, 0.0  ;;  %v434_v18 = vmax.f32 %v430_v14, 0.0 }
 0x160   : > { %435 = vst [vmem:[#allocation8] sm:$0xff] %v431_v15  ;;  %437 = vst [vmem:[#allocation8 + $0x10] sm:$0xff] %v433_v17 }
 0x161   : > { %436 = vst [vmem:[#allocation8 + $0x8] sm:$0xff] %v432_v16  ;;  %438 = vst [vmem:[#allocation8 + $0x18] sm:$0xff] %v434_v18 }
 0x162 PF: > { %p1082_p4 = scmp.eq.s32.totalorder %s561_s18, 3  ;;  %s861_s20 = smov [#allocation8]  }
 0x163   : > { %s451_s22 = sshll.u32 %s861_s20, 4  ;;  %s452_s22 = int_to_ptr.vmem [resolvable:$true] %s451_s22 }
 0x164   : > { %s766_s30 = scalar_lea.vmem %s452_s22, 512  ;;  %p773_p0 = scmp.lt.s32.totalorder %s452_s22, %s452_s22 }
 0x165   : > { %p767_p8 = scmp.ne.s32.totalorder %s452_s22, %s766_s30  ;;  %p774_p10 = scmp.lt.s32.totalorder %s766_s30, %s766_s30 }
 0x167   : > { %p768_p2 = pnand %p767_p8, %p1082_p4  ;;  %p775_p5 = por %p774_p10, %p773_p0 }
 0x169   : > { %p769_p3 = pneg %p768_p2 }
 0x16b   : > { %p776_p6 = pnand %p775_p5, %p769_p3 }
 0x16d   : > { %779 = shalt.err (!%p776_p6)
}
 0x16e   : > { %s780_s18 = scalar_lea.hbm %s1129_s3, 512 }
 0x16f   : > { %p781_p11 = scmp.ne.s32.totalorder %s1129_s3, %s780_s18  ;;  %p786_p7 = scmp.lt.u32.totalorder %s780_s18, %s1129_s3 }
 0x171   : > { %p782_p13 = pnand %p781_p11, %p1082_p4 }
 0x173   : > { %p783_p1 = pneg %p782_p13 }
 0x175   : > { %p788_p9 = pnand %p786_p7, %p783_p1 }
 0x177   : > { %791 = shalt.err (!%p788_p9)
}
 0x178   : > { %s862_s21 = smov 256   ;;  %s863_s5 = smov 16  }
 0x179   : > { %635 = dma.vmem_to_hbm [thread:$0]  (%p1082_p4), %s452_s22, 512, %s1129_s3, [#allocation5], %s862_s21, %s862_s21, %s863_s5  }
 0x17a   : > { %825 = dma.done.wait (%p1082_p4), [#allocation5], 512  }
 0x17b   : > { %827 = vsyncadd (%p1082_p4), [#allocation5], 4294966784 }
 0x17c PF: > { %s20_s17 = sadd.s32 1, %s850_s17   ;;  %s1138_s12 = smov %s834_s13 }
 0x17d   : > { %p17_p12 = scmp.ge.s32.totalorder %s20_s17, 6   ;;  %s1139_s13 = smov %s838_s14 }
 0x17e   : > { %s1140_s14 = smov %s935_s24  ;;  %s1141_s15 = smov %s846_s16 }
 0x17f   : > { %s1142_s16 = smov %s1144_s19  ;;  %19 = sbr.rel (!%p17_p12) target bundleno = 7 (0x7), region = 94 }
 0x186   :  { %467 = vsyncpa [#allocation4], 1 }
 0x187   :  { %469 = vsyncpa [#allocation4 + $0x1], 1 }
 0x188   :  { %470 = vsyncpa [#allocation7], 1 }
 0x189   :  { %472 = vsyncpa [#allocation7 + $0x1], 1 }
 0x18a   :  { %473 = vsyncpa [#allocation5], 1 }
 0x18b   :  { %475 = vsyncpa [#allocation5 + $0x1], 1 }

</bundles_post_ra>
